<compile_context>
chip_gen: v7x
topology: tpu7x:2x2x1
jax: 0.10.0
libtpu: 0.0.40
codegen_flags: <defaults>
</compile_context>

<pallas_src>
import functools

import jax
import jax.numpy as jnp
from jax.experimental import pallas as pl
from jax.experimental.pallas import tpu as pltpu

BN_EPS = 1e-5          # cfg.bn.eps default
L2_EPS = 1e-12         # F.normalize eps default
DROPOUT_P = 0.0        # cfg.gnn.dropout default -> identity
# TODO(synk): if cfg.gnn.dropout > 0, add pltpu.prng_seed + pltpu.stateful_bernoulli mask in pass 2.


def _round_up(a, b):
    return ((a + b - 1) // b) * b


def _linear_stats_kernel(x_ref, w_ref, h_ref, stats_ref):
    """Pass 1: h = x @ w (MXU, native dtype, f32 accum) + streaming per-core BN stats."""
    @pl.when(pl.program_id(1) == 0)
    def _():
        stats_ref[...] = jnp.zeros_like(stats_ref)

    # Feed operands in their native dtype (bf16 stays bf16); accumulate in f32 on the MXU.
    h = jnp.dot(x_ref[...], w_ref[...], preferred_element_type=jnp.float32)

    # Single-pass statistics: column sum and sum-of-squares (variance derived later).
    col_sum = jnp.sum(h, axis=0, keepdims=True)
    col_sq = jnp.sum(h * h, axis=0, keepdims=True)
    stats_ref[...] += jnp.concatenate([col_sum, col_sq], axis=0)[None]  # (1, 2, C) block

    h_ref[...] = h.astype(h_ref.dtype)


def _bn_act_kernel(h_ref, affine_ref, out_ref, *, has_l2norm):
    """Pass 2: folded BN affine -> ReLU -> optional L2 row-normalize."""
    scale = affine_ref[0:1, :]
    shift = affine_ref[1:2, :]
    h = h_ref[...].astype(jnp.float32) * scale + shift   # one mul + one add per element
    h = jnp.maximum(h, 0.0)
    if has_l2norm:
        # F.normalize(p=2, dim=1): x / max(||x||, eps) == x * rsqrt(max(sumsq, eps^2))
        # rsqrt issues on the EUP slot instead of burning VALU cycles on a divide.
        sumsq = jnp.sum(h * h, axis=1, keepdims=True)
        h = h * jax.lax.rsqrt(jnp.maximum(sumsq, L2_EPS * L2_EPS))
    out_ref[...] = h.astype(out_ref.dtype)


def general_layer(x, weight, gamma, beta, *, has_l2norm=False, tile_n=512):
    """x: (N, dim_in); weight: (dim_in, dim_out); gamma/beta: (1, dim_out)."""
    n, dim_in = x.shape
    dim_out = weight.shape[1]

    # Lane-dense output: pad channel axis to a multiple of 128.
    dim_out_p = _round_up(dim_out, 128)
    # Sublane-aligned N tile; zero-padded rows contribute 0 to sum/sumsq.
    tn = min(tile_n, _round_up(n, 8))
    n_tiles = int(pl.cdiv(n, tn))
    # Megacore: split the N tiles across 2 TensorCores (v7x) when they divide evenly.
    n_cores = 2 if (n_tiles >= 2 and n_tiles % 2 == 0) else 1
    tiles_per_core = n_tiles // n_cores
    n_pad = n_tiles * tn

    xp = x if n_pad == n else jnp.pad(x, ((0, n_pad - n), (0, 0)))
    if dim_out_p == dim_out:
        wp, gp, bp = weight, gamma, beta
    else:
        pad_c = ((0, 0), (0, dim_out_p - dim_out))
        wp = jnp.pad(weight, pad_c)                        # zero cols -> h col == 0
        gp = jnp.pad(gamma, pad_c, constant_values=1.0)
        bp = jnp.pad(beta, pad_c)                          # shift == 0 in pad cols

    # Intermediate h: f32 for f32 inputs (exact BN), bf16 for bf16 inputs (half the HBM traffic).
    h_dtype = jnp.float32 if jnp.dtype(x.dtype).itemsize >= 4 else jnp.bfloat16

    # ---- Pass 1: tiled matmul + streaming per-core BatchNorm statistics --------------
    h, stats = pl.pallas_call(
        _linear_stats_kernel,
        out_shape=(jax.ShapeDtypeStruct((n_pad, dim_out_p), h_dtype),
                   jax.ShapeDtypeStruct((n_cores, 2, dim_out_p), jnp.float32)),
        grid=(n_cores, tiles_per_core),
        in_specs=[
            pl.BlockSpec((tn, dim_in), lambda p, t: (p * tiles_per_core + t, 0)),
            pl.BlockSpec((dim_in, dim_out_p), lambda p, t: (0, 0)),   # VMEM-resident weight
        ],
        out_specs=(
            pl.BlockSpec((tn, dim_out_p), lambda p, t: (p * tiles_per_core + t, 0)),
            pl.BlockSpec((1, 2, dim_out_p), lambda p, t: (p, 0, 0)),  # per-core accumulator
        ),
        compiler_params=pltpu.CompilerParams(
            dimension_semantics=("parallel", "arbitrary"),   # stats accumulate along tiles
            vmem_limit_bytes=32 << 20),
    )(xp, wp)

    # Fold BatchNorm (training-mode batch stats) into one scale/shift, computed once.
    stats = jnp.sum(stats, axis=0)                          # combine per-core partials (2, C)
    inv_n = 1.0 / float(n)                                  # true N; padding rows are zero
    mean = stats[0:1, :] * inv_n
    var = jnp.maximum(stats[1:2, :] * inv_n - mean * mean, 0.0)   # guard cancellation
    inv_std = jax.lax.rsqrt(var + BN_EPS)
    scale = gp.astype(jnp.float32) * inv_std                # (1, C)
    shift = bp.astype(jnp.float32) - mean * scale           # (1, C)
    affine = jnp.concatenate([scale, shift], axis=0)        # (2, C) single operand for pass 2

    # ---- Pass 2: BN affine + ReLU (+ L2), independent tiles -> "parallel" --------------
    out = pl.pallas_call(
        functools.partial(_bn_act_kernel, has_l2norm=has_l2norm),
        out_shape=jax.ShapeDtypeStruct((n_pad, dim_out_p), x.dtype),
        grid=(n_tiles,),
        in_specs=[
            pl.BlockSpec((tn, dim_out_p), lambda i: (i, 0)),
            pl.BlockSpec((2, dim_out_p), lambda i: (0, 0)),
        ],
        out_specs=pl.BlockSpec((tn, dim_out_p), lambda i: (i, 0)),
        compiler_params=pltpu.CompilerParams(
            dimension_semantics=("parallel",),
            vmem_limit_bytes=32 << 20),
    )(h, affine)

    return out[:n, :dim_out]


def general_layer_ref(x, weight, gamma, beta, *, has_l2norm=False):
    """Pure-JAX reference for correctness."""
    h = x.astype(jnp.float32) @ weight.astype(jnp.float32)
    mean = jnp.mean(h, axis=0, keepdims=True)
    var = jnp.mean((h - mean) ** 2, axis=0, keepdims=True)
    h = (h - mean) / jnp.sqrt(var + BN_EPS)
    h = h * gamma + beta
    h = jnp.maximum(h, 0.0)
    if has_l2norm:
        norm = jnp.sqrt(jnp.sum(h * h, axis=1, keepdims=True))
        h = h / jnp.maximum(norm, L2_EPS)
    return h.astype(x.dtype)


if __name__ == "__main__":
    key = jax.random.PRNGKey(0)
    kx, kw, kx2, kw2 = jax.random.split(key, 4)

    # Case 1: aligned shapes (lane-dense already), no L2 norm, single tile.
    N, DIM_IN, DIM_OUT = 64, 32, 128
    x = jax.random.normal(kx, (N, DIM_IN), dtype=jnp.float32)
    bound = 1.0 / (DIM_IN ** 0.5)
    weight = jax.random.uniform(kw, (DIM_IN, DIM_OUT), jnp.float32, -bound, bound)
    gamma = jnp.ones((1, DIM_OUT), jnp.float32)
    beta = jnp.zeros((1, DIM_OUT), jnp.float32)

    out = jax.block_until_ready(general_layer(x, weight, gamma, beta, has_l2norm=False))
    ref = general_layer_ref(x, weight, gamma, beta, has_l2norm=False)
    assert out.shape == (N, DIM_OUT)
    assert jnp.allclose(out, ref, atol=2e-4, rtol=2e-4), "mismatch vs reference (case 1)"

    # Case 2: non-aligned N / dim_out (exercises padding paths) + L2 norm.
    N2, DIN2, DOUT2 = 50, 24, 96
    x2 = jax.random.normal(kx2, (N2, DIN2), dtype=jnp.float32)
    bound2 = 1.0 / (DIN2 ** 0.5)
    w2 = jax.random.uniform(kw2, (DIN2, DOUT2), jnp.float32, -bound2, bound2)
    g2 = jnp.ones((1, DOUT2), jnp.float32)
    b2 = jnp.zeros((1, DOUT2), jnp.float32)

    out2 = jax.block_until_ready(general_layer(x2, w2, g2, b2, has_l2norm=True))
    ref2 = general_layer_ref(x2, w2, g2, b2, has_l2norm=True)
    assert out2.shape == (N2, DOUT2)
    assert jnp.allclose(out2, ref2, atol=2e-4, rtol=2e-4), "mismatch vs reference (case 2)"

    # Case 3: multi-tile N (4 tiles -> 2-core split of the stats accumulation) + affine BN + L2.
    N3, DIN3, DOUT3 = 1024, 48, 128
    k3x, k3w, k3g, k3b = jax.random.split(jax.random.PRNGKey(7), 4)
    x3 = jax.random.normal(k3x, (N3, DIN3), dtype=jnp.float32)
    bound3 = 1.0 / (DIN3 ** 0.5)
    w3 = jax.random.uniform(k3w, (DIN3, DOUT3), jnp.float32, -bound3, bound3)
    g3 = jax.random.uniform(k3g, (1, DOUT3), jnp.float32, 0.5, 1.5)
    b3 = 0.1 * jax.random.normal(k3b, (1, DOUT3), dtype=jnp.float32)

    out3 = jax.block_until_ready(general_layer(x3, w3, g3, b3, has_l2norm=True, tile_n=256))
    ref3 = general_layer_ref(x3, w3, g3, b3, has_l2norm=True)
    assert out3.shape == (N3, DOUT3)
    assert jnp.allclose(out3, ref3, atol=2e-4, rtol=2e-4), "mismatch vs reference (case 3)"

    print("KERNEL_OK")
</pallas_src>

<mosaic_0001>
module attributes {stable_mosaic.version = 11 : i64} {
  func.func @_linear_stats_kernel(%arg0: i32, %arg1: i32, %arg2: memref<64x32xf32, #tpu.memory_space<vmem>>, %arg3: memref<32x128xf32, #tpu.memory_space<vmem>>, %arg4: memref<64x128xf32, #tpu.memory_space<vmem>>, %arg5: memref<1x2x128xf32, #tpu.memory_space<vmem>>) attributes {dimension_semantics = [#tpu.dimension_semantics<parallel>, #tpu.dimension_semantics<arbitrary>], iteration_bounds = array<i64: 1, 1>, scalar_prefetch = 0 : i64, scratch_operands = 0 : i64, tpu.core_type = #tpu.core_type<tc>, window_params = [{transform_indices = @transform_0, window_bounds = array<i64: 64, 32>}, {pipeline_mode = #tpu.pipeline_mode<synchronous>, transform_indices = @transform_1, window_bounds = array<i64: 32, 128>}, {transform_indices = @transform_2, window_bounds = array<i64: 64, 128>}, {transform_indices = @transform_3, window_bounds = array<i64: 1, 2, 128>}]} {
    %c0_i32 = arith.constant 0 : i32
    %0 = arith.cmpi eq, %arg1, %c0_i32 : i32
    %1 = arith.extui %0 : i1 to i32
    %c0_i32_0 = arith.constant 0 : i32
    %2 = arith.cmpi ne, %1, %c0_i32_0 : i32
    scf.if %2 {
      %cst_14 = arith.constant 0.000000e+00 : f32
      %17 = vector.broadcast %cst_14 : f32 to vector<1x2x128xf32>
      %c0_15 = arith.constant 0 : index
      %c0_16 = arith.constant 0 : index
      %c0_17 = arith.constant 0 : index
      %18 = vector.load %arg5[%c0_15, %c0_16, %c0_17] : memref<1x2x128xf32, #tpu.memory_space<vmem>>, vector<1x2x128xf32>
      tpu.vector_store %arg5[%c0_15, %c0_16, %c0_17], %17 {strides = array<i32>} : memref<1x2x128xf32, #tpu.memory_space<vmem>>, vector<1x2x128xf32>,
    } else {
    }
    %c0 = arith.constant 0 : index
    %c0_1 = arith.constant 0 : index
    %3 = vector.load %arg2[%c0, %c0_1] : memref<64x32xf32, #tpu.memory_space<vmem>>, vector<64x32xf32>
    %c0_2 = arith.constant 0 : index
    %c0_3 = arith.constant 0 : index
    %4 = vector.load %arg3[%c0_2, %c0_3] : memref<32x128xf32, #tpu.memory_space<vmem>>, vector<32x128xf32>
    %cst = arith.constant dense<0.000000e+00> : vector<64x128xf32>
    %5 = tpu.matmul %3, %4, %cst {dimension_numbers = #tpu.dot_dimension_numbers<[1], [0], [0], [1], [0, 0, 1, 1], [], []>} : vector<64x32xf32>, vector<32x128xf32>, vector<64x128xf32> -> vector<64x128xf32>
    %cst_4 = arith.constant dense<0.000000e+00> : vector<128xf32>
    %6 = vector.multi_reduction <add>, %5, %cst_4 [0] : vector<64x128xf32> to vector<128xf32>
    %7 = vector.shape_cast %6 : vector<128xf32> to vector<1x128xf32>
    %8 = arith.mulf %5, %5 : vector<64x128xf32>
    %cst_5 = arith.constant dense<0.000000e+00> : vector<128xf32>
    %9 = vector.multi_reduction <add>, %8, %cst_5 [0] : vector<64x128xf32> to vector<128xf32>
    %10 = vector.shape_cast %9 : vector<128xf32> to vector<1x128xf32>
    %c0_6 = arith.constant 0 : index
    %c0_7 = arith.constant 0 : index
    %c0_8 = arith.constant 0 : index
    %11 = vector.load %arg5[%c0_6, %c0_7, %c0_8] : memref<1x2x128xf32, #tpu.memory_space<vmem>>, vector<1x2x128xf32>
    %12 = tpu.concatenate %7, %10 in 0 : vector<1x128xf32>, vector<1x128xf32> -> vector<2x128xf32>
    %13 = vector.shape_cast %12 : vector<2x128xf32> to vector<1x2x128xf32>
    %14 = arith.addf %11, %13 : vector<1x2x128xf32>
    %c0_9 = arith.constant 0 : index
    %c0_10 = arith.constant 0 : index
    %c0_11 = arith.constant 0 : index
    %15 = vector.load %arg5[%c0_9, %c0_10, %c0_11] : memref<1x2x128xf32, #tpu.memory_space<vmem>>, vector<1x2x128xf32>
    tpu.vector_store %arg5[%c0_9, %c0_10, %c0_11], %14 {strides = array<i32>} : memref<1x2x128xf32, #tpu.memory_space<vmem>>, vector<1x2x128xf32>,
    %c0_12 = arith.constant 0 : index
    %c0_13 = arith.constant 0 : index
    %16 = vector.load %arg4[%c0_12, %c0_13] : memref<64x128xf32, #tpu.memory_space<vmem>>, vector<64x128xf32>
    tpu.vector_store %arg4[%c0_12, %c0_13], %5 {strides = array<i32>} : memref<64x128xf32, #tpu.memory_space<vmem>>, vector<64x128xf32>,
    return
  }
  func.func @transform_0(%arg0: i32, %arg1: i32) -> (i32, i32) {
    %c1_i32 = arith.constant 1 : i32
    %0 = arith.muli %arg0, %c1_i32 : i32
    %1 = arith.addi %0, %arg1 : i32
    %c0_i32 = arith.constant 0 : i32
    %c0_i32_0 = arith.constant 0 : i32
    return %1, %c0_i32 : i32, i32
  }
  func.func @transform_1(%arg0: i32, %arg1: i32) -> (i32, i32) {
    %c0_i32 = arith.constant 0 : i32
    %c0_i32_0 = arith.constant 0 : i32
    %c0_i32_1 = arith.constant 0 : i32
    return %c0_i32, %c0_i32_0 : i32, i32
  }
  func.func @transform_2(%arg0: i32, %arg1: i32) -> (i32, i32) {
    %c1_i32 = arith.constant 1 : i32
    %0 = arith.muli %arg0, %c1_i32 : i32
    %1 = arith.addi %0, %arg1 : i32
    %c0_i32 = arith.constant 0 : i32
    %c0_i32_0 = arith.constant 0 : i32
    return %1, %c0_i32 : i32, i32
  }
  func.func @transform_3(%arg0: i32, %arg1: i32) -> (i32, i32, i32) {
    %c0_i32 = arith.constant 0 : i32
    %c0_i32_0 = arith.constant 0 : i32
    %c0_i32_1 = arith.constant 0 : i32
    return %arg0, %c0_i32, %c0_i32_0 : i32, i32, i32
  }
}

</mosaic_0001>

<bundles_post_ra>
// kernel: tpu_custom_call.1
= control target key start
LH: loop header
LB: loop body
LE: loop exit
PB: predicated region body
PF: predicated region fallthrough
CT: control target
= control target key end

     0   :  { %9 = vsyncpa [#allocation3], 0  ;;  %vm56_vm0 = vcmask 261120   ;;  %s471_s0 = inlined_call_operand.vmem [shape: f32[64,32], index: 0, kind: input, shape index: {}]   ;;  %s472_s1 = inlined_call_operand.vmem [shape: f32[32,128], index: 1, kind: input, shape index: {}]   ;;  %s473_s2 = inlined_call_operand.hbm [shape: f32[64,128], index: 2, kind: output, shape index: {0}]   ;;  %s474_s3 = inlined_call_operand.hbm [shape: f32[1,2,128], index: 3, kind: output, shape index: {1}]  }
   0x1   :  { %v52_v0 = vld [vmem:[%s472_s1] sm:$0xff]  ;;  %v53_v1 = vld [vmem:[%s472_s1 + $0x8] sm:$0xff]  ;;  %v54_v2 = vld [vmem:[%s472_s1 + $0x10] sm:$0xff] }
   0x2   :  { %v313_v3 = vpack.c.bf16 %v53_v1, %v52_v0  ;;  %v55_v4 = vld [vmem:[%s472_s1 + $0x18] sm:$0xff]  ;;  %v44_v5 = vld [vmem:[%s471_s0] sm:$0xff] }
   0x3   :  { %v317_v6 = vpack.c.bf16 %v55_v4, %v54_v2  ;;  %301 = vmatprep.mubr.msk.f32.mxu0 %vm56_vm0, %v44_v5  ;;  %v48_v7 = vld [vmem:[%s471_s0 + $0x20] sm:$0xff] }
   0x4   :  { %314 = vmatprep.subr.bf16.mxu0 %v313_v3  ;;  %321 = vmatprep.subr.bf16.mxu1 %v313_v3 }
   0x5   :  { %316 = vmatpush3.bf16.msra.mxu0 %v313_v3  ;;  %323 = vmatpush3.bf16.msra.mxu1 %v313_v3 }
   0x6   :  { %10 = vsyncpa [#allocation5], 0  ;;  %318 = vmatprep.subr.bf16.mxu0 %v317_v6  ;;  %322 = vmatprep.subr.bf16.mxu1 %v317_v6  ;;  %v45_v8 = vld [vmem:[%s471_s0 + $0x8] sm:$0xff]  ;;  %v46_v10 = vld [vmem:[%s471_s0 + $0x10] sm:$0xff]  ;;  %v378_v14 = vmov 0.0   ;;  %s379_s8 = smov [#allocation2]  }
   0x7   :  { %307 = vmatprep.mubr.msk.f32.mxu1 %vm56_vm0, %v48_v7  ;;  %v49_v9 = vld [vmem:[%s471_s0 + $0x28] sm:$0xff]  ;;  %v50_v11 = vld [vmem:[%s471_s0 + $0x30] sm:$0xff]  ;;  %v47_v12 = vld [vmem:[%s471_s0 + $0x18] sm:$0xff]  ;;  %43 = vst [vmem:[#allocation4] sm:$0x3] %v378_v14  ;;  %s242_s9 = sshll.u32 %s379_s8, 4  ;;  %s243_s9 = int_to_ptr.vmem [resolvable:$true] %s242_s9 }
   0x8   :  { %v51_v13 = vld [vmem:[%s471_s0 + $0x38] sm:$0xff]  ;;  %s330_s0 = scalar_lea.vmem %s243_s9, 1024  ;;  %p335_p1 = scmp.lt.s32.totalorder %s243_s9, %s243_s9 }
   0x9   :  { %320 = vmatpush3.bf16.msra.mxu0 %v317_v6  ;;  %324 = vmatpush3.bf16.msra.mxu1 %v317_v6  ;;  %p331_p0 = scmp.ne.s32.totalorder %s243_s9, %s330_s0  ;;  %p336_p2 = scmp.lt.s32.totalorder %s330_s0, %s330_s0 }
   0xb   :  { %p337_p3 = por %p336_p2, %p335_p1 }
   0xc   :  { %302 = vmatmul.mubr.msk.f32.vlgmr.msra.gmra.mrb[0].mxu0 %vm56_vm0, %v45_v8  ;;  %308 = vmatmul.mubr.msk.f32.vlgmr.msra.gmra.mrb[0].mxu1 %vm56_vm0, %v49_v9 }
   0xd   :  { %304 = vmatprep.mubr.msk.f32.mxu0 %vm56_vm0, %v46_v10  ;;  %310 = vmatprep.mubr.msk.f32.mxu1 %vm56_vm0, %v50_v11  ;;  %p338_p4 = pnand %p337_p3, %p331_p0 }
  0x10   :  { %305 = vmatmul.mubr.msk.f32.gmra.mrb[2].mxu0 %vm56_vm0, %v47_v12  ;;  %311 = vmatmul.mubr.msk.f32.gmra.mrb[2].mxu1 %vm56_vm0, %v51_v13 }
  0xdf   :  { %v303_v15 = vpop.f32.mrb[0].mxu0  ;;  %v309_v16 = vpop.f32.mrb[0].mxu1 }
  0xe0   :  { %v200_v17 = vmul.f32 %v303_v15, %v303_v15  ;;  %226 = vst [vmem:[#allocation2 + $0x8] sm:$0xff] %v303_v15  ;;  %v147_v18 = vpop.f32.mrb[1].mxu0  ;;  %230 = vst [vmem:[#allocation2 + $0x28] sm:$0xff] %v309_v16  ;;  %v167_v19 = vpop.f32.mrb[1].mxu1 }
  0xe1   :  { %v186_v20 = vadd.f32 %v303_v15, %v147_v18  ;;  %v199_v21 = vmul.f32 %v147_v18, %v147_v18  ;;  %225 = vst [vmem:[#allocation2] sm:$0xff] %v147_v18  ;;  %229 = vst [vmem:[#allocation2 + $0x20] sm:$0xff] %v167_v19 }
  0xe3   :  { %v207_v22 = vadd.f32 %v200_v17, %v199_v21  ;;  %v306_v23 = vpop.f32.mrb[2].mxu0  ;;  %v312_v24 = vpop.f32.mrb[2].mxu1 }
  0xe4   :  { %228 = vst [vmem:[#allocation2 + $0x18] sm:$0xff] %v306_v23  ;;  %v157_v25 = vpop.f32.mrb[3].mxu0  ;;  %232 = vst [vmem:[#allocation2 + $0x38] sm:$0xff] %v312_v24  ;;  %v177_v26 = vpop.f32.mrb[3].mxu1 }
  0xe5   :  { %v187_v27 = vadd.f32 %v186_v20, %v157_v25  ;;  %v201_v28 = vmul.f32 %v157_v25, %v157_v25  ;;  %227 = vst [vmem:[#allocation2 + $0x10] sm:$0xff] %v157_v25  ;;  %231 = vst [vmem:[#allocation2 + $0x30] sm:$0xff] %v177_v26 }
  0xe6   :  { %341 = shalt.err (!%p338_p4)
}
  0xe7   :  { %s342_s12 = scalar_lea.hbm %s473_s2, 1024 }
  0xe8   :  { %p343_p5 = scmp.ne.s32.totalorder %s473_s2, %s342_s12  ;;  %p346_p6 = scmp.lt.u32.totalorder %s342_s12, %s473_s2 }
  0xea   :  { %p348_p7 = pnand %p346_p6, %p343_p5 }
  0xec   :  { %351 = shalt.err (!%p348_p7)
}
  0xed   :  { %s380_s17 = smov 128   ;;  %s381_s18 = smov 8   ;;  %v202_v29 = vmul.f32 %v306_v23, %v306_v23  ;;  %v188_v30 = vadd.f32 %v306_v23, %v187_v27  ;;  %v208_v31 = vadd.f32 %v207_v22, %v201_v28  ;;  %v203_v32 = vmul.f32 %v167_v19, %v167_v19  ;;  %v220_v57 = vld [vmem:[#allocation4] sm:$0x3] }
  0xee   :  { %248 = dma.vmem_to_hbm [thread:$0]  %s243_s9, 1024, %s473_s2, [#allocation3], %s380_s17, %s380_s17, %s381_s18   ;;  %v204_v35 = vmul.f32 %v309_v16, %v309_v16  ;;  %v205_v38 = vmul.f32 %v177_v26, %v177_v26  ;;  %v206_v41 = vmul.f32 %v312_v24, %v312_v24  ;;  %vm221_vm1 = vcmask 1040384  }
  0xef   :  { %v209_v33 = vadd.f32 %v208_v31, %v202_v29  ;;  %v189_v34 = vadd.f32 %v188_v30, %v167_v19  ;;  %s382_s2 = smov [#allocation4]  }
  0xf0   :  { %s255_s21 = sshll.u32 %s382_s2, 4  ;;  %s256_s21 = int_to_ptr.vmem [resolvable:$true] %s255_s21 }
  0xf1   :  { %v210_v36 = vadd.f32 %v209_v33, %v203_v32  ;;  %v190_v37 = vadd.f32 %v309_v16, %v189_v34  ;;  %s352_s22 = scalar_lea.vmem %s256_s21, 32  ;;  %p357_p9 = scmp.lt.s32.totalorder %s256_s21, %s256_s21 }
  0xf2   :  { %p353_p8 = scmp.ne.s32.totalorder %s256_s21, %s352_s22  ;;  %p358_p10 = scmp.lt.s32.totalorder %s352_s22, %s352_s22 }
  0xf3   :  { %v191_v39 = vadd.f32 %v190_v37, %v177_v26  ;;  %v211_v40 = vadd.f32 %v210_v36, %v204_v35 }
  0xf4   :  { %p359_p11 = por %p358_p10, %p357_p9 }
  0xf5   :  { %v192_v42 = vadd.f32 %v312_v24, %v191_v39  ;;  %v212_v43 = vadd.f32 %v211_v40, %v205_v38 }
  0xf6   :  { %p360_p12 = pnand %p359_p11, %p353_p8 }
  0xf7   :  { %v193_v44 = vrot.slane %v192_v42, 4  ;;  %v213_v45 = vadd.f32 %v212_v43, %v206_v41 }
  0xf9   :  { %v194_v46 = vadd.f32 %v193_v44, %v192_v42  ;;  %v214_v47 = vrot.slane %v213_v45, 4 }
  0xfb   :  { %v195_v48 = vrot.slane %v194_v46, 2  ;;  %v215_v49 = vadd.f32 %v214_v47, %v213_v45 }
  0xfd   :  { %v196_v50 = vadd.f32 %v195_v48, %v194_v46  ;;  %v216_v51 = vrot.slane %v215_v49, 2 }
  0xff   :  { %v197_v52 = vrot.slane %v196_v50, 1  ;;  %v217_v53 = vadd.f32 %v216_v51, %v215_v49 }
 0x101   :  { %v218_v54 = vrot.slane %v217_v53, 1  ;;  %v198_v55 = vadd.f32 %v197_v52, %v196_v50 }
 0x103   :  { %v219_v56 = vadd.f32 %v218_v54, %v217_v53 }
 0x105   :  { %v222_v58 = vsel %vm221_vm1, %v198_v55, %v219_v56 }
 0x106   :  { %v223_v59 = vadd.f32 %v222_v58, %v220_v57 }
 0x108   :  { %224 = vst [vmem:[#allocation4] sm:$0x3] %v223_v59 }
 0x109   :  { %363 = shalt.err (!%p360_p12)
}
 0x10a   :  { %s364_s24 = scalar_lea.hbm %s474_s3, 32 }
 0x10b   :  { %p365_p13 = scmp.ne.s32.totalorder %s474_s3, %s364_s24  ;;  %p368_p0 = scmp.lt.u32.totalorder %s364_s24, %s474_s3 }
 0x10d   :  { %p370_p1 = pnand %p368_p0, %p365_p13 }
 0x10f   :  { %373 = shalt.err (!%p370_p1)
}
 0x110   :  { %258 = dma.vmem_to_hbm [thread:$0]  %s256_s21, 32, %s474_s3, [#allocation5]  }
 0x111   :  { %374 = dma.done.wait [#allocation3], 1024  }
 0x112   :  { %375 = vsyncadd [#allocation3], 4294966272 }
 0x113   :  { %376 = dma.done.wait [#allocation5], 32  }
 0x114   :  { %377 = vsyncadd [#allocation5], 4294967264 }
 0x115   :  { %265 = vsyncpa [#allocation3], 1 }
 0x116   :  { %266 = vsyncpa [#allocation5], 1 }

</bundles_post_ra>
